<compile_context>
chip_gen: v6e
topology: v6e:2x2x1
jax: 0.10.0
libtpu: 0.0.40
codegen_flags: <defaults>
</compile_context>

<pallas_src>
import functools

import numpy as np

import jax
import jax.numpy as jnp
from jax import lax
from jax.experimental import pallas as pl
from jax.experimental.pallas import tpu as pltpu


# ------------------------------ fused Pallas kernel ------------------------------


def _decoder_kernel(lat_ref, w_ref, o_ref, *, layers):
    """layers: static tuple of (w_row_off, w_rows, w_cols, bias_row_off, apply_relu).

    All weights/biases live in one packed (rows, 128) VMEM operand; every slice below is a
    static, 8-row-aligned, lane-0-based view (zero-cost).  One MXU matmul per folded layer.
    """
    x = lat_ref[...]
    for (w_off, w_rows, w_cols, b_off, relu) in layers:
        w = w_ref[w_off:w_off + w_rows, 0:w_cols]
        b = w_ref[b_off:b_off + 1, 0:w_cols]
        x = jnp.dot(x, w, preferred_element_type=jnp.float32) + b
        if relu:
            x = jnp.maximum(x, 0.0)
    o_ref[...] = x.astype(o_ref.dtype)


def ae_decoder_forward(latent, folded, *, batch_tile=512):
    """Fused forward: one pallas_call; output reshaped to (B, seq_len, n_channels)."""
    B, D = latent.shape
    D_pad = folded["d_pad"]
    packed = folded["packed"]
    layers = folded["layers_meta"]
    out_cols = folded["out_cols"]            # seq_len * n_channels (valid columns)
    out_cols_pad = folded["out_cols_pad"]    # padded to a multiple of 128 (lane-dense stores)

    if D != D_pad:                           # pad latent features to the packed W01 row count
        latent = jnp.pad(latent, ((0, 0), (0, D_pad - D)))

    # Batch tiling: TB is either the full (small) batch or a multiple of 8.
    TB = min(batch_tile, B)
    B_pad = pl.cdiv(B, TB) * TB
    if B_pad != B:
        latent = jnp.pad(latent, ((0, B_pad - B), (0, 0)))

    flops = 2 * B_pad * sum(m[1] * m[2] for m in layers)
    bytes_accessed = 4 * (B_pad * D_pad + int(packed.size) + B_pad * out_cols_pad)
    cost = pl.CostEstimate(flops=flops, transcendentals=0, bytes_accessed=bytes_accessed)

    kernel = functools.partial(_decoder_kernel, layers=layers)

    out_flat = pl.pallas_call(
        kernel,
        out_shape=jax.ShapeDtypeStruct((B_pad, out_cols_pad), jnp.float32),
        grid=(B_pad // TB,),
        in_specs=[
            pl.BlockSpec((TB, D_pad), lambda i: (i, 0)),         # streamed batch tile
            pl.BlockSpec(packed.shape, lambda i: (0, 0)),        # weights: VMEM-resident
        ],
        out_specs=pl.BlockSpec((TB, out_cols_pad), lambda i: (i, 0)),
        compiler_params=pltpu.CompilerParams(dimension_semantics=("parallel",)),
        cost_estimate=cost,
    )(latent, packed)

    out = out_flat[:B, :out_cols]
    return out.reshape(B, folded["seq_len"], folded["n_channels"])


# ------------------------ host-side (one-time) parameter folding ------------------------


def prepare_decoder_params(params, hidden_dims, n_channels, enc_out_len, latent_dim):
    """Fold the whole decoder into a chain of dense matmuls and pack it for the kernel.

    - fc columns permuted so the fc output is channels-last flat (l-major, c-minor).
    - each {Upsample(2x,'nearest') + zero-pad(1) + Conv1d(k=3)} folded into a dense matrix
      M_i (L_in*Cin, 2*L_in*Cout) + lane-tiled bias.
    - fc folded into layer 0: W01 = fc_w @ M0, b01 = fc_b @ M0 + c0 (exact; ReLU comes after).
    - everything concatenated into ONE (rows, 128) f32 operand, rows padded to multiples of 8,
      last layer's columns zero-padded to a multiple of 128 for lane-dense output stores.
    """
    C0, L0 = hidden_dims[0], enc_out_len

    # torch .view gives (B, C0, L0) -> flat index c*L0 + l; we want l*C0 + c.
    perm = np.asarray([c * L0 + l for l in range(L0) for c in range(C0)], dtype=np.int64)
    fc_w = np.asarray(params["fc_w"], np.float64)[:, perm]        # (D, L0*C0)
    fc_b = np.asarray(params["fc_b"], np.float64)[:, perm]        # (1, L0*C0)

    mats, biases = [], []
    L_in = L0
    for i in range(len(hidden_dims)):
        w = np.asarray(params[f"w{i}"], np.float64)               # (3, Cin, Cout) taps
        b = np.asarray(params[f"b{i}"], np.float64)               # (1, Cout)
        K, Cin, Cout = w.shape
        L_out = 2 * L_in
        M = np.zeros((L_in * Cin, L_out * Cout), np.float64)
        for j in range(L_out):                   # output position
            for k in range(K):                   # conv tap
                t = j + k - 1                    # index into upsampled (unpadded) signal
                if 0 <= t < L_out:               # else: zero padding contributes nothing
                    li = t // 2                  # nearest-neighbor 2x upsample source row
                    M[li * Cin:(li + 1) * Cin, j * Cout:(j + 1) * Cout] += w[k]
        mats.append(M)
        biases.append(np.tile(b, (1, L_out)))    # (1, L_out*Cout), l-major / c-minor
        L_in = L_out
    seq_len = L_in

    # Fold fc into layer 0 (algebraically exact: the only nonlinearity is AFTER layer 0).
    M0 = mats[0]
    mats[0] = fc_w @ M0                          # (latent_dim, 2*L0*C1)
    biases[0] = fc_b @ M0 + biases[0]

    n_lay = len(mats)
    pad8 = lambda v: -(-v // 8) * 8
    pad128 = lambda v: -(-v // 128) * 128
    col_pad = [pad128(mats[i].shape[1]) for i in range(n_lay)]
    row_pad = [pad8(latent_dim)] + [col_pad[i - 1] for i in range(1, n_lay)]
    width = max(col_pad)                         # lane width of the packed operand (128 here)

    chunks, meta, off = [], [], 0
    for i in range(n_lay):                       # weight matrices (rows padded to mult of 8)
        Mp = np.zeros((row_pad[i], width), np.float32)
        Mp[:mats[i].shape[0], :mats[i].shape[1]] = mats[i]
        chunks.append(Mp)
        meta.append([off, row_pad[i], col_pad[i], None, i < n_lay - 1])
        off += row_pad[i]
    for i in range(n_lay):                       # biases, each in its own 8-row-aligned block
        bp = np.zeros((8, width), np.float32)
        bp[0, :biases[i].shape[1]] = biases[i][0]
        chunks.append(bp)
        meta[i][3] = off
        off += 8
    packed = jnp.asarray(np.concatenate(chunks, axis=0))   # (rows, 128) f32, single operand

    return {
        "packed": packed,
        "layers_meta": tuple(tuple(m) for m in meta),
        "d_pad": pad8(latent_dim),
        "out_cols": mats[-1].shape[1],
        "out_cols_pad": col_pad[-1],
        "seq_len": seq_len,
        "n_channels": n_channels,
    }


# ------------------------------ pure-JAX reference ------------------------------


def ae_decoder_reference(latent, params, hidden_dims, n_channels, enc_out_len):
    B = latent.shape[0]
    x = latent @ params["fc_w"] + params["fc_b"]
    x = x.reshape(B, hidden_dims[0], enc_out_len)                  # NCW, matches torch .view
    n_layers = len(hidden_dims)
    for i in range(n_layers):
        x = jnp.repeat(x, 2, axis=2)                               # Upsample(2x, 'nearest')
        w_oiw = jnp.transpose(params[f"w{i}"], (2, 1, 0))          # (Cout, Cin, K)
        x = lax.conv_general_dilated(
            x, w_oiw, window_strides=(1,), padding=((1, 1),),
            dimension_numbers=("NCH", "OIH", "NCH"))
        x = x + params[f"b{i}"].reshape(1, -1, 1)
        if i < n_layers - 1:
            x = jnp.maximum(x, 0.0)
    return jnp.transpose(x, (0, 2, 1))                             # torch permute(0, 2, 1)


# ------------------------------------ main ------------------------------------


if __name__ == "__main__":
    seq_len, n_channels, latent_dim = 16, 4, 8
    hidden_dims = [32, 16]
    B = 2

    enc_out_len = seq_len
    for _ in hidden_dims[::-1]:
        enc_out_len = enc_out_len // 2                             # -> 4

    key = jax.random.PRNGKey(0)
    k = jax.random.split(key, 8)
    params = {
        "fc_w": 0.1 * jax.random.normal(k[0], (latent_dim, hidden_dims[0] * enc_out_len), jnp.float32),
        "fc_b": 0.1 * jax.random.normal(k[1], (1, hidden_dims[0] * enc_out_len), jnp.float32),
        "w0":   0.1 * jax.random.normal(k[2], (3, hidden_dims[0], hidden_dims[1]), jnp.float32),
        "b0":   0.1 * jax.random.normal(k[3], (1, hidden_dims[1]), jnp.float32),
        "w1":   0.1 * jax.random.normal(k[4], (3, hidden_dims[1], n_channels), jnp.float32),
        "b1":   0.1 * jax.random.normal(k[5], (1, n_channels), jnp.float32),
    }
    latent = jax.random.normal(k[6], (B, latent_dim), jnp.float32)

    folded = prepare_decoder_params(params, hidden_dims, n_channels, enc_out_len, latent_dim)

    # Small-batch path (single grid step).
    out = ae_decoder_forward(latent, folded)
    out = jax.block_until_ready(out)
    ref = ae_decoder_reference(latent, params, hidden_dims, n_channels, enc_out_len)
    assert out.shape == (B, seq_len, n_channels), out.shape
    np.testing.assert_allclose(np.asarray(out), np.asarray(ref), rtol=1e-4, atol=1e-4)

    # Larger-batch path: batch grid with VMEM-resident weights + "parallel" semantics.
    B2 = 16
    latent2 = jax.random.normal(k[7], (B2, latent_dim), jnp.float32)
    out2 = jax.block_until_ready(ae_decoder_forward(latent2, folded, batch_tile=8))
    ref2 = ae_decoder_reference(latent2, params, hidden_dims, n_channels, enc_out_len)
    np.testing.assert_allclose(np.asarray(out2), np.asarray(ref2), rtol=1e-4, atol=1e-4)

    print("KERNEL_OK")
</pallas_src>

<mosaic_0001>
module attributes {stable_mosaic.version = 11 : i64} {
  func.func @_decoder_kernel(%arg0: i32, %arg1: memref<2x8xf32, #tpu.memory_space<vmem>>, %arg2: memref<152x128xf32, #tpu.memory_space<vmem>>, %arg3: memref<2x128xf32, #tpu.memory_space<vmem>>) attributes {dimension_semantics = [#tpu.dimension_semantics<parallel>], iteration_bounds = array<i64: 1>, scalar_prefetch = 0 : i64, scratch_operands = 0 : i64, tpu.core_type = #tpu.core_type<tc>, window_params = [{transform_indices = @transform_0, window_bounds = array<i64: 2, 8>}, {pipeline_mode = #tpu.pipeline_mode<synchronous>, transform_indices = @transform_1, window_bounds = array<i64: 152, 128>}, {transform_indices = @transform_2, window_bounds = array<i64: 2, 128>}]} {
    %c0 = arith.constant 0 : index
    %c0_0 = arith.constant 0 : index
    %0 = vector.load %arg1[%c0, %c0_0] : memref<2x8xf32, #tpu.memory_space<vmem>>, vector<2x8xf32>
    %c0_1 = arith.constant 0 : index
    %c0_2 = arith.constant 0 : index
    %1 = vector.load %arg2[%c0_1, %c0_2] : memref<152x128xf32, #tpu.memory_space<vmem>>, vector<8x128xf32>
    %c136 = arith.constant 136 : index
    %c0_3 = arith.constant 0 : index
    %2 = vector.load %arg2[%c136, %c0_3] : memref<152x128xf32, #tpu.memory_space<vmem>>, vector<1x128xf32>
    %cst = arith.constant dense<0.000000e+00> : vector<2x128xf32>
    %3 = tpu.matmul %0, %1, %cst {dimension_numbers = #tpu.dot_dimension_numbers<[1], [0], [0], [1], [0, 0, 1, 1], [], []>} : vector<2x8xf32>, vector<8x128xf32>, vector<2x128xf32> -> vector<2x128xf32>
    %4 = vector.broadcast %2 : vector<1x128xf32> to vector<2x128xf32>
    %5 = arith.addf %3, %4 : vector<2x128xf32>
    %cst_4 = arith.constant 0.000000e+00 : f32
    %6 = vector.broadcast %cst_4 : f32 to vector<2x128xf32>
    %7 = arith.maximumf %5, %6 : vector<2x128xf32>
    %c8 = arith.constant 8 : index
    %c0_5 = arith.constant 0 : index
    %8 = vector.load %arg2[%c8, %c0_5] : memref<152x128xf32, #tpu.memory_space<vmem>>, vector<128x128xf32>
    %c144 = arith.constant 144 : index
    %c0_6 = arith.constant 0 : index
    %9 = vector.load %arg2[%c144, %c0_6] : memref<152x128xf32, #tpu.memory_space<vmem>>, vector<1x128xf32>
    %cst_7 = arith.constant dense<0.000000e+00> : vector<2x128xf32>
    %10 = tpu.matmul %7, %8, %cst_7 {dimension_numbers = #tpu.dot_dimension_numbers<[1], [0], [0], [1], [0, 0, 1, 1], [], []>} : vector<2x128xf32>, vector<128x128xf32>, vector<2x128xf32> -> vector<2x128xf32>
    %11 = vector.broadcast %9 : vector<1x128xf32> to vector<2x128xf32>
    %12 = arith.addf %10, %11 : vector<2x128xf32>
    %c0_8 = arith.constant 0 : index
    %c0_9 = arith.constant 0 : index
    %13 = vector.load %arg3[%c0_8, %c0_9] : memref<2x128xf32, #tpu.memory_space<vmem>>, vector<2x128xf32>
    tpu.vector_store %arg3[%c0_8, %c0_9], %12 {strides = array<i32>} : memref<2x128xf32, #tpu.memory_space<vmem>>, vector<2x128xf32>,
    return
  }
  func.func @transform_0(%arg0: i32) -> (i32, i32) {
    %c0_i32 = arith.constant 0 : i32
    %c0_i32_0 = arith.constant 0 : i32
    return %arg0, %c0_i32 : i32, i32
  }
  func.func @transform_1(%arg0: i32) -> (i32, i32) {
    %c0_i32 = arith.constant 0 : i32
    %c0_i32_0 = arith.constant 0 : i32
    %c0_i32_1 = arith.constant 0 : i32
    return %c0_i32, %c0_i32_0 : i32, i32
  }
  func.func @transform_2(%arg0: i32) -> (i32, i32) {
    %c0_i32 = arith.constant 0 : i32
    %c0_i32_0 = arith.constant 0 : i32
    return %arg0, %c0_i32 : i32, i32
  }
}

</mosaic_0001>

<bundles_post_ra>
// kernel: tpu_custom_call.1
= control target key start
LH: loop header
LB: loop body
LE: loop exit
PB: predicated region body
PF: predicated region fallthrough
CT: control target
= control target key end

     0   :  { %7 = vsyncpa [#allocation3], 0  ;;  %s394_s0 = inlined_call_operand.hbm [shape: f32[2,8], index: 0, kind: input, shape index: {}]   ;;  %s395_s1 = inlined_call_operand.hbm [shape: f32[152,128], index: 1, kind: input, shape index: {}]   ;;  %s396_s2 = inlined_call_operand.hbm [shape: f32[2,128], index: 2, kind: output, shape index: {}]  }
   0x1   :  { %8 = vsyncpa [#allocation6], 0 }
   0x2   :  { %9 = vsyncpa [#allocation4], 0  ;;  %s363_s9 = smov [#allocation2]   ;;  %s364_s11 = smov [#allocation5]  }
   0x3   :  { %s16_s10 = sshll.u32 %s363_s9, 4  ;;  %s25_s12 = sshll.u32 %s364_s11, 4  ;;  %s17_s10 = int_to_ptr.vmem [resolvable:$true] %s16_s10  ;;  %s26_s12 = int_to_ptr.vmem [resolvable:$true] %s25_s12 }
   0x4   :  { %s305_s13 = scalar_lea.vmem %s17_s10, 32  ;;  %p310_p1 = scmp.lt.s32.totalorder %s17_s10, %s17_s10 }
   0x5   :  { %p306_p0 = scmp.ne.s32.totalorder %s17_s10, %s305_s13  ;;  %p311_p2 = scmp.lt.s32.totalorder %s305_s13, %s305_s13 }
   0x7   :  { %p312_p3 = por %p311_p2, %p310_p1 }
   0x9   :  { %p313_p4 = pnand %p312_p3, %p306_p0 }
   0xb   :  { %316 = shalt.err (!%p313_p4)
}
   0xc   :  { %19 = dma.hbm_to_vmem [thread:$0]  %s394_s0, 32, %s17_s10, [#allocation3]  }
   0xd   :  { %s325_s16 = scalar_lea.vmem %s26_s12, 2432  ;;  %p330_p6 = scmp.lt.s32.totalorder %s26_s12, %s26_s12 }
   0xe   :  { %p326_p5 = scmp.ne.s32.totalorder %s26_s12, %s325_s16  ;;  %p331_p7 = scmp.lt.s32.totalorder %s325_s16, %s325_s16 }
  0x10   :  { %p332_p8 = por %p331_p7, %p330_p6 }
  0x12   :  { %p333_p9 = pnand %p332_p8, %p326_p5 }
  0x14   :  { %336 = shalt.err (!%p333_p9)
}
  0x15   :  { %s365_s17 = smov 128   ;;  %s366_s18 = smov 8  }
  0x16   :  { %31 = dma.hbm_to_vmem [thread:$0]  %s395_s1, 2432, %s26_s12, [#allocation6], %s365_s17, %s365_s17, %s366_s18  }
  0x17   :  { %357 = dma.done.wait [#allocation3], 32  }
  0x18   :  { %358 = vsyncadd [#allocation3], 4294967264 }
  0x19   :  { %359 = dma.done.wait [#allocation6], 2432  }
  0x1a   :  { %360 = vsyncadd [#allocation6], 4294964864  ;;  %v367_v0 = vmov 0.0   ;;  %vm368_vm0 = vmmov 0   ;;  %vm45_vm1 = vcmask 64512   ;;  %v39_v1 = vld [vmem:[#allocation5] sm:$0xff] }
  0x1b   :  { %250 = vmatprep.subr.mxu0 %v367_v0  ;;  %252 = vmatprep.mubr.msk.f32.mxu0 %vm368_vm0, %v367_v0  ;;  %v38_v2 = vld [vmem:[#allocation2] sm:$0x3]  ;;  %v135_v3 = vld [vmem:[#allocation5 + $0x80] sm:$0xff]  ;;  %v133_v5 = vld [vmem:[#allocation5 + $0x70] sm:$0xff]  ;;  %s369_s0 = smov [#allocation7]  }
  0x1c   :  { %255 = vmatprep.subr.mxu1 %v367_v0  ;;  %287 = vmatprep.mubr.msk.f32.mxu1 %vm368_vm0, %v367_v0  ;;  %v134_v4 = vld [vmem:[#allocation5 + $0x78] sm:$0xff]  ;;  %v132_v6 = vld [vmem:[#allocation5 + $0x68] sm:$0xff]  ;;  %v131_v7 = vld [vmem:[#allocation5 + $0x60] sm:$0xff]  ;;  %s218_s1 = sshll.u32 %s369_s0, 4  ;;  %s219_s1 = int_to_ptr.vmem [resolvable:$true] %s218_s1 }
  0x1d   :  { %251 = vmatpush3.msra.mxu0 %v39_v1  ;;  %256 = vmatpush3.msra.mxu1 %v135_v3  ;;  %v130_v8 = vld [vmem:[#allocation5 + $0x58] sm:$0xff]  ;;  %v129_v9 = vld [vmem:[#allocation5 + $0x50] sm:$0xff]  ;;  %v128_v10 = vld [vmem:[#allocation5 + $0x48] sm:$0xff]  ;;  %s337_s21 = scalar_lea.vmem %s219_s1, 32  ;;  %p342_p11 = scmp.lt.s32.totalorder %s219_s1, %s219_s1 }
  0x1e   :  { %253 = vmatmul.mubr.msk.f32.vlgmr.msra.gmra.mxu0 %vm45_vm1, %v38_v2  ;;  %257 = vmatprep.subr.mxu1 %v367_v0  ;;  %v127_v11 = vld [vmem:[#allocation5 + $0x40] sm:$0xff]  ;;  %v126_v12 = vld [vmem:[#allocation5 + $0x38] sm:$0xff]  ;;  %v125_v13 = vld [vmem:[#allocation5 + $0x30] sm:$0xff]  ;;  %p338_p10 = scmp.ne.s32.totalorder %s219_s1, %s337_s21  ;;  %p343_p12 = scmp.lt.s32.totalorder %s337_s21, %s337_s21 }
  0x1f   :  { %258 = vmatpush3.msra.mxu1 %v134_v4  ;;  %v124_v14 = vld [vmem:[#allocation5 + $0x28] sm:$0xff]  ;;  %v123_v15 = vld [vmem:[#allocation5 + $0x20] sm:$0xff]  ;;  %v122_v16 = vld [vmem:[#allocation5 + $0x18] sm:$0xff] }
  0x20   :  { %259 = vmatprep.subr.mxu1 %v367_v0  ;;  %v121_v17 = vld [vmem:[#allocation5 + $0x10] sm:$0xff]  ;;  %v120_v18 = vld [vmem:[#allocation5 + $0x8] sm:$0xff]  ;;  %p344_p13 = por %p343_p12, %p342_p11 }
  0x21   :  { %260 = vmatpush3.msra.mxu1 %v133_v5  ;;  %v228_v19 = vld [vmem:[#allocation5 + $0x88] ss:$0 sm:$0xff]  ;;  %v230_v24 = vld [vmem:[#allocation5 + $0x90] ss:$0 sm:$0xff] }
  0x22   :  { %261 = vmatprep.subr.mxu1 %v367_v0  ;;  %p345_p0 = pnand %p344_p13, %p338_p10 }
  0x23   :  { %262 = vmatpush3.msra.mxu1 %v132_v6 }
  0x24   :  { %263 = vmatprep.subr.mxu1 %v367_v0 }
  0x25   :  { %264 = vmatpush3.msra.mxu1 %v131_v7 }
  0x26   :  { %265 = vmatprep.subr.mxu1 %v367_v0 }
  0x27   :  { %266 = vmatpush3.msra.mxu1 %v130_v8 }
  0x28   :  { %267 = vmatprep.subr.mxu1 %v367_v0 }
  0x29   :  { %268 = vmatpush3.msra.mxu1 %v129_v9 }
  0x2a   :  { %269 = vmatprep.subr.mxu1 %v367_v0 }
  0x2b   :  { %270 = vmatpush3.msra.mxu1 %v128_v10 }
  0x2c   :  { %271 = vmatprep.subr.mxu1 %v367_v0 }
  0x2d   :  { %272 = vmatpush3.msra.mxu1 %v127_v11 }
  0x2e   :  { %273 = vmatprep.subr.mxu1 %v367_v0 }
  0x2f   :  { %274 = vmatpush3.msra.mxu1 %v126_v12 }
  0x30   :  { %275 = vmatprep.subr.mxu1 %v367_v0 }
  0x31   :  { %276 = vmatpush3.msra.mxu1 %v125_v13 }
  0x32   :  { %277 = vmatprep.subr.mxu1 %v367_v0 }
  0x33   :  { %278 = vmatpush3.msra.mxu1 %v124_v14 }
  0x34   :  { %279 = vmatprep.subr.mxu1 %v367_v0 }
  0x35   :  { %280 = vmatpush3.msra.mxu1 %v123_v15 }
  0x36   :  { %281 = vmatprep.subr.mxu1 %v367_v0 }
  0x37   :  { %282 = vmatpush3.msra.mxu1 %v122_v16 }
  0x38   :  { %283 = vmatprep.subr.mxu1 %v367_v0 }
  0x39   :  { %284 = vmatpush3.msra.mxu1 %v121_v17 }
  0x3a   :  { %285 = vmatprep.subr.mxu1 %v367_v0 }
  0x3b   :  { %286 = vmatpush3.msra.mxu1 %v120_v18 }
  0xde   :  { %v115_v20 = vpop.f32.mrf.mxu0 }
  0xdf   :  { %v116_v21 = vadd.f32 %v228_v19, %v115_v20 }
  0xe0   :  { %v254_v22 = vpop.f32.mrf.mxu0 }
  0xe1   :  { %v119_v23 = vmax.f32 %v116_v21, 0.0 }
  0xe3   :  { %288 = vmatmul.mubr.f32.vlgmr.msra.gmra.mxu1 %v119_v23 }
 0x1a3   :  { %v207_v25 = vpop.f32.mrf.mxu1 }
 0x1a4   :  { %v208_v26 = vadd.f32 %v230_v24, %v207_v25 }
 0x1a5   :  { %v289_v27 = vpop.f32.mrf.mxu1 }
 0x1a6   :  { %211 = vst [vmem:[#allocation7] sm:$0x3] %v208_v26 }
 0x1a7   :  { %348 = shalt.err (!%p345_p0)
}
 0x1a8   :  { %221 = dma.vmem_to_hbm [thread:$0]  %s219_s1, 32, %s396_s2, [#allocation4]  }
 0x1a9   :  { %361 = dma.done.wait [#allocation4], 32  }
 0x1aa   :  { %362 = vsyncadd [#allocation4], 4294967264 }
 0x1ab   :  { %225 = vsyncpa [#allocation3], 1 }
 0x1ac   :  { %226 = vsyncpa [#allocation6], 1 }
 0x1ad   :  { %227 = vsyncpa [#allocation4], 1 }

</bundles_post_ra>
